<compile_context>
chip_gen: v7x
topology: tpu7x:2x2x1
jax: 0.10.0
libtpu: 0.0.40
codegen_flags: <defaults>
</compile_context>

<pallas_src>
import functools
import re

import jax
import jax.numpy as jnp
import numpy as np
from jax import lax
from jax.experimental import pallas as pl
from jax.experimental.pallas import tpu as pltpu


# ---------------------------------------------------------------------------
# small helpers
# ---------------------------------------------------------------------------
def _round_up(v, m):
    return ((v + m - 1) // m) * m


def _pad_axis(a, axis, target):
    pad = target - a.shape[axis]
    if pad <= 0:
        return a
    widths = [(0, 0)] * a.ndim
    widths[axis] = (0, pad)
    return jnp.pad(a, widths)


@functools.lru_cache(maxsize=1)
def _tpu_generation():
    try:
        kind = jax.devices()[0].device_kind.lower()
        m = re.search(r"v(\d+)", kind)
        if m:
            return int(m.group(1))
    except Exception:
        pass
    return 6


def _gen_config():
    gen = _tpu_generation()
    if gen >= 7:
        # 64 MiB VMEM / TC, 2 TCs per chip, bf16 VALU + MRB.
        return dict(tm=256, vmem_limit=48 * 1024 * 1024,
                    kk_budget=16 * 1024 * 1024, two_tc=True,
                    combine_dtype=jnp.bfloat16)
    if gen == 6:
        # 128 MiB VMEM, 1 TC, native bf16 VALU.
        return dict(tm=512, vmem_limit=96 * 1024 * 1024,
                    kk_budget=40 * 1024 * 1024, two_tc=False,
                    combine_dtype=jnp.bfloat16)
    # v5e and older: 128 MiB VMEM, 1 TC, no bf16 VPU -> combine in f32.
    return dict(tm=512, vmem_limit=96 * 1024 * 1024,
                kk_budget=40 * 1024 * 1024, two_tc=False,
                combine_dtype=jnp.float32)


def _choose_kk_block(KK, c_in, tm, c_out_pad, kd_pad, budget_bytes):
    """Pick how many kernel positions one reduction (k) grid step covers.

    Legal block lane-dims: kkb == KK (full extent) or (kkb * c_in) % 128 == 0.
    Byte counts include the physical lane/sublane padding of every VMEM block.
    """
    cands = [d for d in range(1, KK + 1)
             if KK % d == 0 and (d == KK or (d * c_in) % 128 == 0)]
    coef_lanes = _round_up(5 * KK, 128)

    def step_bytes(d):
        ck_pad = _round_up(d * c_in, 128)
        corners = 4 * 2 * tm * ck_pad * 2          # 4 streams, dbl-buffered, bf16
        coef = 2 * tm * coef_lanes * 4             # packed coefficient slab, f32
        expand = 2 * _round_up(d, 8) * ck_pad * 2  # resident one-hot expand, bf16
        weight = 2 * kd_pad * c_out_pad * 2        # resident main weight, bf16
        vecs = 2 * 2 * 8 * c_out_pad * 4           # scale/shift, sublane-padded
        out = 2 * tm * c_out_pad * 4               # resident f32 output block
        return corners + coef + expand + weight + vecs + out

    fitting = [d for d in cands if step_bytes(d) <= budget_bytes]
    return max(fitting) if fitting else min(cands)


# ---------------------------------------------------------------------------
# Pallas kernels
# ---------------------------------------------------------------------------
def _matmul_bias_kernel(x_ref, w_ref, b_ref, o_ref):
    # offset/mask conv hot path: im2col patches @ W_off^T + b_off (f32; the
    # offsets feed floor() so full precision is kept; output lane-padded).
    acc = jnp.dot(x_ref[...], w_ref[...], preferred_element_type=jnp.float32)
    o_ref[...] = (acc + b_ref[...]).astype(o_ref.dtype)


def _dcn_fused_kernel(vtl, vtr, vbl, vbr, coef_ref, *rest, kkb, c_in, KK, n_k,
                      combine_dtype, use_mxu_expand, weight_resident):
    # deformable-conv hot path: sigmoid(mask) + bilinear combine -> bf16 matmul
    # -> folded BatchNorm affine -> ReLU, fused.
    if use_mxu_expand:
        e_ref, w_ref, scale_ref, shift_ref, o_ref = rest
    else:
        w_ref, scale_ref, shift_ref, o_ref = rest

    k = pl.program_id(1)
    ck = kkb * c_in

    # --- per-(pixel, kk) coefficients arrive as one packed [tm, 5*KK] slab ---
    coef = coef_ref[...]

    def coef_chunk(c):                       # [tm, kkb]
        stream = coef[:, c * KK:(c + 1) * KK]
        if n_k == 1:
            return stream
        return lax.dynamic_slice_in_dim(stream, k * kkb, kkb, axis=1)

    msk = jax.nn.sigmoid(coef_chunk(4))      # sigmoid on the small [tm, kkb]
    cw = [coef_chunk(c) * msk for c in range(4)]          # f32 [tm, kkb]

    vals = [v[...].astype(combine_dtype) for v in (vtl, vtr, vbl, vbr)]

    if use_mxu_expand:
        # c_in not lane-aligned: expand [tm, kkb] -> [tm, kkb*c_in] via a tiny
        # RESIDENT bf16 one-hot matmul (constant input, not rebuilt per step).
        e = e_ref[...]
        cols = None
        for c in range(4):
            exp = jnp.dot(cw[c].astype(jnp.bfloat16), e,
                          preferred_element_type=jnp.float32).astype(combine_dtype)
            term = exp * vals[c]
            cols = term if cols is None else cols + term
    else:
        # c_in lane-aligned: broadcast each per-kk coefficient across its
        # channel slice on the VPU -- zero MXU result/pop traffic.
        cwc = [w.astype(combine_dtype) for w in cw]
        parts = []
        for kk in range(kkb):
            sl = slice(kk * c_in, (kk + 1) * c_in)
            part = None
            for c in range(4):
                term = cwc[c][:, kk:kk + 1] * vals[c][:, sl]
                part = term if part is None else part + term
            parts.append(part)
        cols = parts[0] if kkb == 1 else jnp.concatenate(parts, axis=1)

    if weight_resident and n_k > 1:
        start = pl.multiple_of(k * ck, ck)
        w_blk = w_ref[pl.ds(start, ck), :]   # slice rows of the resident weight
    else:
        w_blk = w_ref[...]

    partial = jnp.dot(cols.astype(jnp.bfloat16), w_blk,
                      preferred_element_type=jnp.float32)

    if n_k == 1:
        y = partial * scale_ref[...] + shift_ref[...]
        o_ref[...] = jnp.maximum(y, 0.0).astype(o_ref.dtype)
    else:
        # Output block index is constant across k -> it is resident; use it as
        # the accumulator (no separate VMEM scratch).
        @pl.when(k == 0)
        def _init():
            o_ref[...] = jnp.zeros_like(o_ref)

        o_ref[...] += partial

        @pl.when(k == n_k - 1)
        def _finalize():
            y = o_ref[...] * scale_ref[...] + shift_ref[...]
            o_ref[...] = jnp.maximum(y, 0.0)


# ---------------------------------------------------------------------------
# pallas_call wrappers
# ---------------------------------------------------------------------------
def matmul_bias(x, w_t, b, *, cfg=None):
    """[M, Kd] @ [Kd, Nd] + b, with M padded to a tile multiple and Nd padded
    to 128 lanes (lane-dense stores).  Kept in f32 (offsets feed floor())."""
    if cfg is None:
        cfg = _gen_config()
    M, Kd = x.shape
    Nd = w_t.shape[1]

    tm = min(cfg["tm"], max(8, _round_up(M, 8)))
    Mp = _round_up(M, tm)
    n_m = Mp // tm
    if cfg["two_tc"] and n_m > 1 and n_m % 2 == 1:
        Mp += tm                                 # even grid -> both v7x TCs busy
        n_m += 1
    Ndp = _round_up(Nd, 128)

    xp = _pad_axis(x, 0, Mp)
    wp = _pad_axis(w_t, 1, Ndp)
    bp = _pad_axis(b.reshape(1, Nd), 1, Ndp)

    out = pl.pallas_call(
        _matmul_bias_kernel,
        out_shape=jax.ShapeDtypeStruct((Mp, Ndp), x.dtype),
        grid=(n_m,),
        in_specs=[
            pl.BlockSpec((tm, Kd), lambda i: (i, 0)),
            pl.BlockSpec((Kd, Ndp), lambda i: (0, 0)),
            pl.BlockSpec((1, Ndp), lambda i: (0, 0)),
        ],
        out_specs=pl.BlockSpec((tm, Ndp), lambda i: (i, 0)),
        compiler_params=pltpu.CompilerParams(
            dimension_semantics=("parallel",),
            vmem_limit_bytes=cfg["vmem_limit"]),
        cost_estimate=pl.CostEstimate(
            flops=2 * Mp * Kd * Ndp,
            transcendentals=0,
            bytes_accessed=4 * (Mp * Kd + Kd * Ndp + Mp * Ndp)),
    )(xp, wp, bp)
    return out[:M, :Nd]


def dcn_fused(corner_vals, coef, w_t, scale, shift, *, cfg=None):
    """Fused DCNv2 main conv + folded BatchNorm(eval) + ReLU.

    corner_vals: 4 x [M, KK*C_in] gathered pixels (bf16), channel-minor order
    coef       : [M, 5*KK] packed (wtl, wtr, wbl, wbr, mask_logit), f32
    w_t        : [KK*C_in, C_out] main conv weight (channel-minor reduction)
    scale/shift: [C_out] folded BatchNorm affine
    """
    if cfg is None:
        cfg = _gen_config()
    M, CK = corner_vals[0].shape
    KK = coef.shape[1] // 5
    c_in = CK // KK
    C_out = w_t.shape[1]

    tm = min(cfg["tm"], max(8, _round_up(M, 8)))
    Mp = _round_up(M, tm)
    n_m = Mp // tm
    if cfg["two_tc"] and n_m > 1 and n_m % 2 == 1:
        Mp += tm                                 # even grid for the two v7x TCs
        n_m += 1
    Cop = _round_up(C_out, 128)                  # lane-dense output stores
    kkb = _choose_kk_block(KK, c_in, tm, Cop, _round_up(CK, 8), cfg["kk_budget"])
    n_k = KK // kkb
    ck = kkb * c_in
    weight_resident = (n_k == 1) or (2 * _round_up(CK, 8) * Cop * 2
                                     <= cfg["kk_budget"] // 4)
    use_mxu_expand = (c_in % 128 != 0)

    vals = [_pad_axis(v, 0, Mp) for v in corner_vals]        # already bf16
    coef_p = _pad_axis(coef, 0, Mp).astype(jnp.float32)
    w_p = _pad_axis(w_t, 1, Cop).astype(jnp.bfloat16)
    scale_p = _pad_axis(scale.reshape(1, C_out), 1, Cop).astype(jnp.float32)
    shift_p = _pad_axis(shift.reshape(1, C_out), 1, Cop).astype(jnp.float32)

    val_spec = pl.BlockSpec((tm, ck), lambda i, k: (i, k))
    coef_spec = pl.BlockSpec((tm, 5 * KK), lambda i, k: (i, 0))
    if weight_resident:
        w_spec = pl.BlockSpec((CK, Cop), lambda i, k: (0, 0))   # stays in VMEM
    else:
        w_spec = pl.BlockSpec((ck, Cop), lambda i, k: (k, 0))
    vec_spec = pl.BlockSpec((1, Cop), lambda i, k: (0, 0))

    extra_inputs, extra_specs = [], []
    if use_mxu_expand:
        # Constant one-hot expansion E[p, p*c_in + c] = 1, bf16, VMEM-resident.
        lane = jnp.arange(ck) // c_in
        e = (lane[None, :] == jnp.arange(kkb)[:, None]).astype(jnp.bfloat16)
        extra_inputs = [e]
        extra_specs = [pl.BlockSpec((kkb, ck), lambda i, k: (0, 0))]

    kernel = functools.partial(
        _dcn_fused_kernel, kkb=kkb, c_in=c_in, KK=KK, n_k=n_k,
        combine_dtype=cfg["combine_dtype"], use_mxu_expand=use_mxu_expand,
        weight_resident=weight_resident)

    bytes_acc = (4 * Mp * CK * 2 + Mp * 5 * KK * 4
                 + (1 if weight_resident else n_m) * CK * Cop * 2
                 + Mp * Cop * 4)
    out = pl.pallas_call(
        kernel,
        out_shape=jax.ShapeDtypeStruct((Mp, Cop), jnp.float32),
        grid=(n_m, n_k),
        in_specs=[val_spec] * 4 + [coef_spec] + extra_specs
                 + [w_spec, vec_spec, vec_spec],
        out_specs=pl.BlockSpec((tm, Cop), lambda i, k: (i, 0)),
        compiler_params=pltpu.CompilerParams(
            dimension_semantics=("parallel", "arbitrary"),
            vmem_limit_bytes=cfg["vmem_limit"]),
        cost_estimate=pl.CostEstimate(
            flops=2 * Mp * CK * Cop + 12 * Mp * CK,
            transcendentals=Mp * KK,
            bytes_accessed=bytes_acc),
    )(*vals, coef_p, *extra_inputs, w_p, scale_p, shift_p)
    return out[:M, :C_out]


# ---------------------------------------------------------------------------
# Forward pass (glue in plain JAX, hot paths in Pallas)
# ---------------------------------------------------------------------------
def deform_conv_forward(x, params, *, stride=1, padding=1, dilation=1,
                        eps=1e-5, use_pallas=True):
    N, C_in, H, W = x.shape
    K = params["weight"].shape[-1]
    C_out = params["weight"].shape[0]
    KK = K * K
    H_out = (H + 2 * padding - dilation * (K - 1) - 1) // stride + 1
    W_out = (W + 2 * padding - dilation * (K - 1) - 1) // stride + 1
    M = N * H_out * W_out
    f = x.dtype
    cfg = _gen_config()

    # NHWC internally: gathered pixels are contiguous C_in (lane) vectors and
    # the reduction dim is (kh, kw, c_in) channel-minor -> no transposes.
    x_nhwc = x.transpose(0, 2, 3, 1)

    # ---- conv_offset_mask: standard conv via im2col + Pallas matmul (f32) ---
    # TODO(synk): block the reduction dim of matmul_bias over the (kh, kw)
    # slices so the 9x im2col blow-up never round-trips HBM.
    xp = jnp.pad(x_nhwc, ((0, 0), (padding, padding), (padding, padding), (0, 0)))
    cols = []
    for i in range(K):
        for j in range(K):
            cols.append(xp[:, i:i + stride * H_out:stride,
                           j:j + stride * W_out:stride, :])
    patches = jnp.stack(cols, axis=3).reshape(M, KK * C_in)   # kk-major, c-minor

    w_off = params["offset_weight"].transpose(0, 2, 3, 1).reshape(3 * KK, KK * C_in)
    if use_pallas:
        out_off = matmul_bias(patches, w_off.T, params["offset_bias"], cfg=cfg)
    else:
        out_off = patches @ w_off.T + params["offset_bias"][None, :]
    out_off = out_off.reshape(N, H_out, W_out, 3 * KK)

    # DCN wrapper: o1, o2, mask = chunk(out, 3); offset = cat(o1, o2)
    # (interpreted here as o1 = dy, o2 = dx per kernel position)
    dy = out_off[..., 0:KK]
    dx = out_off[..., KK:2 * KK]
    mask_logit = out_off[..., 2 * KK:3 * KK].reshape(M, KK)

    # ---- sampling coords + bilinear corner gather (data movement, plain JAX)
    # TODO(synk): move this data-dependent gather inside the fused kernel
    # (x_nhwc with memory_space=pl.ANY + SMEM index table via scalar prefetch
    # + make_async_copy) so the 4 [M, KK*C_in] corner arrays never hit HBM.
    i_idx = jnp.repeat(jnp.arange(K), K).astype(f)
    j_idx = jnp.tile(jnp.arange(K), K).astype(f)
    base_y = (jnp.arange(H_out, dtype=f) * stride - padding)[:, None] + i_idx[None, :] * dilation
    base_x = (jnp.arange(W_out, dtype=f) * stride - padding)[:, None] + j_idx[None, :] * dilation
    p_y = base_y[None, :, None, :] + dy                       # [N, Ho, Wo, KK]
    p_x = base_x[None, None, :, :] + dx

    y0 = jnp.floor(p_y)
    x0 = jnp.floor(p_x)
    ly, lx = p_y - y0, p_x - x0
    hy, hx = 1.0 - ly, 1.0 - lx
    y0i, x0i = y0.astype(jnp.int32), x0.astype(jnp.int32)
    y1i, x1i = y0i + 1, x0i + 1

    # Gather directly in the kernel's feed dtype (bf16 on the Pallas path) so
    # there is no standalone f32->bf16 cast pass over the big corner arrays.
    gather_dtype = jnp.bfloat16 if use_pallas else f
    x_flat = x_nhwc.astype(gather_dtype).reshape(N, H * W, C_in)

    def gather_corner(yi, xi, wy, wx):
        valid = ((yi >= 0) & (yi < H) & (xi >= 0) & (xi < W)).astype(f)
        idx = (jnp.clip(yi, 0, H - 1) * W + jnp.clip(xi, 0, W - 1)
               ).reshape(N, H_out * W_out * KK)
        vals = jax.vmap(lambda xf, ix: jnp.take(xf, ix, axis=0))(x_flat, idx)
        vals = vals.reshape(M, KK * C_in)        # channel-minor, no transpose
        wgt = (wy * wx * valid).reshape(M, KK)   # stays [M, KK]; expanded in-kernel
        return vals, wgt

    vtl, wtl = gather_corner(y0i, x0i, hy, hx)
    vtr, wtr = gather_corner(y0i, x1i, hy, lx)
    vbl, wbl = gather_corner(y1i, x0i, ly, hx)
    vbr, wbr = gather_corner(y1i, x1i, ly, lx)

    # ---- fold BatchNorm(eval) + conv bias into per-channel scale/shift ------
    rstd = 1.0 / jnp.sqrt(params["bn_var"] + eps)
    scale = params["bn_gamma"] * rstd
    shift = (params["bias"] - params["bn_mean"]) * scale + params["bn_beta"]
    w_main = params["weight"].transpose(0, 2, 3, 1).reshape(C_out, KK * C_in)

    if use_pallas:
        # pack the 5 small coefficient streams into one slab: 1 DMA per step
        coef = jnp.concatenate([wtl, wtr, wbl, wbr, mask_logit], axis=1)
        out = dcn_fused((vtl, vtr, vbl, vbr), coef, w_main.T, scale, shift,
                        cfg=cfg)
    else:  # pure-JAX (f32) reference of the fused kernel math
        msk = jax.nn.sigmoid(mask_logit)

        def expand(w2):   # [M, KK] -> [M, KK*C_in], channel-minor broadcast
            return jnp.repeat(w2, C_in, axis=1)

        cols2 = (expand(wtl * msk) * vtl + expand(wtr * msk) * vtr
                 + expand(wbl * msk) * vbl + expand(wbr * msk) * vbr)
        out = jnp.maximum(cols2 @ w_main.T * scale[None, :] + shift[None, :], 0.0)

    return out.reshape(N, H_out, W_out, C_out).transpose(0, 3, 1, 2)  # NCHW


# ---------------------------------------------------------------------------
def make_params(key, C_in, C_out, K):
    ks = jax.random.split(key, 8)
    KK = K * K
    # NOTE: real DCN zero-inits conv_offset_mask; small random values are used
    # here (deterministically) so the deformable sampling path is exercised.
    return {
        "weight": 0.1 * jax.random.normal(ks[0], (C_out, C_in, K, K), jnp.float32),
        "bias": 0.1 * jax.random.normal(ks[1], (C_out,), jnp.float32),
        "offset_weight": 0.05 * jax.random.normal(ks[2], (3 * KK, C_in, K, K), jnp.float32),
        "offset_bias": 0.05 * jax.random.normal(ks[3], (3 * KK,), jnp.float32),
        "bn_gamma": 1.0 + 0.1 * jax.random.normal(ks[4], (C_out,), jnp.float32),
        "bn_beta": 0.1 * jax.random.normal(ks[5], (C_out,), jnp.float32),
        "bn_mean": 0.1 * jax.random.normal(ks[6], (C_out,), jnp.float32),
        "bn_var": jnp.abs(1.0 + 0.1 * jax.random.normal(ks[7], (C_out,), jnp.float32)),
    }


if __name__ == "__main__":
    key = jax.random.PRNGKey(0)
    k_x, k_p = jax.random.split(key)
    N, C_in, C_out, H, W, K = 2, 4, 8, 16, 16, 3

    x = jax.random.normal(k_x, (N, C_in, H, W), jnp.float32)
    params = make_params(k_p, C_in, C_out, K)

    out = deform_conv_forward(x, params, stride=1, padding=1, use_pallas=True)
    out = jax.block_until_ready(out)

    ref = deform_conv_forward(x, params, stride=1, padding=1, use_pallas=False)
    ref = jax.block_until_ready(ref)

    assert out.shape == (N, C_out, H, W)
    np.testing.assert_allclose(np.asarray(out), np.asarray(ref), rtol=5e-2, atol=5e-2)
    print("KERNEL_OK")
</pallas_src>

<mosaic_0001>
module attributes {stable_mosaic.version = 11 : i64} {
  func.func @_matmul_bias_kernel(%arg0: i32, %arg1: memref<512x36xf32, #tpu.memory_space<vmem>>, %arg2: memref<36x128xf32, #tpu.memory_space<vmem>>, %arg3: memref<1x128xf32, #tpu.memory_space<vmem>>, %arg4: memref<512x128xf32, #tpu.memory_space<vmem>>) attributes {dimension_semantics = [#tpu.dimension_semantics<parallel>], iteration_bounds = array<i64: 1>, scalar_prefetch = 0 : i64, scratch_operands = 0 : i64, tpu.core_type = #tpu.core_type<tc>, window_params = [{transform_indices = @transform_0, window_bounds = array<i64: 512, 36>}, {pipeline_mode = #tpu.pipeline_mode<synchronous>, transform_indices = @transform_1, window_bounds = array<i64: 36, 128>}, {pipeline_mode = #tpu.pipeline_mode<synchronous>, transform_indices = @transform_2, window_bounds = array<i64: 1, 128>}, {transform_indices = @transform_3, window_bounds = array<i64: 512, 128>}]} {
    %c0 = arith.constant 0 : index
    %c0_0 = arith.constant 0 : index
    %0 = vector.load %arg1[%c0, %c0_0] : memref<512x36xf32, #tpu.memory_space<vmem>>, vector<512x36xf32>
    %c0_1 = arith.constant 0 : index
    %c0_2 = arith.constant 0 : index
    %1 = vector.load %arg2[%c0_1, %c0_2] : memref<36x128xf32, #tpu.memory_space<vmem>>, vector<36x128xf32>
    %cst = arith.constant dense<0.000000e+00> : vector<512x128xf32>
    %2 = tpu.matmul %0, %1, %cst {dimension_numbers = #tpu.dot_dimension_numbers<[1], [0], [0], [1], [0, 0, 1, 1], [], []>} : vector<512x36xf32>, vector<36x128xf32>, vector<512x128xf32> -> vector<512x128xf32>
    %c0_3 = arith.constant 0 : index
    %c0_4 = arith.constant 0 : index
    %3 = vector.load %arg3[%c0_3, %c0_4] : memref<1x128xf32, #tpu.memory_space<vmem>>, vector<1x128xf32>
    %4 = vector.broadcast %3 : vector<1x128xf32> to vector<512x128xf32>
    %5 = arith.addf %2, %4 : vector<512x128xf32>
    %c0_5 = arith.constant 0 : index
    %c0_6 = arith.constant 0 : index
    %6 = vector.load %arg4[%c0_5, %c0_6] : memref<512x128xf32, #tpu.memory_space<vmem>>, vector<512x128xf32>
    tpu.vector_store %arg4[%c0_5, %c0_6], %5 {strides = array<i32>} : memref<512x128xf32, #tpu.memory_space<vmem>>, vector<512x128xf32>,
    return
  }
  func.func @transform_0(%arg0: i32) -> (i32, i32) {
    %c0_i32 = arith.constant 0 : i32
    %c0_i32_0 = arith.constant 0 : i32
    return %arg0, %c0_i32 : i32, i32
  }
  func.func @transform_1(%arg0: i32) -> (i32, i32) {
    %c0_i32 = arith.constant 0 : i32
    %c0_i32_0 = arith.constant 0 : i32
    %c0_i32_1 = arith.constant 0 : i32
    return %c0_i32, %c0_i32_0 : i32, i32
  }
  func.func @transform_2(%arg0: i32) -> (i32, i32) {
    %c0_i32 = arith.constant 0 : i32
    %c0_i32_0 = arith.constant 0 : i32
    %c0_i32_1 = arith.constant 0 : i32
    return %c0_i32, %c0_i32_0 : i32, i32
  }
  func.func @transform_3(%arg0: i32) -> (i32, i32) {
    %c0_i32 = arith.constant 0 : i32
    %c0_i32_0 = arith.constant 0 : i32
    return %arg0, %c0_i32 : i32, i32
  }
}

</mosaic_0001>

<bundles_post_ra>
// kernel: tpu_custom_call.1
= control target key start
LH: loop header
LB: loop body
LE: loop exit
PB: predicated region body
PF: predicated region fallthrough
CT: control target
= control target key end

     0   :  { %8 = vsyncpa [#allocation3], 0  ;;  %s1369_s0 = inlined_call_operand.hbm [shape: f32[512,36], index: 0, kind: input, shape index: {}]   ;;  %s1370_s1 = inlined_call_operand.hbm [shape: f32[36,128], index: 1, kind: input, shape index: {}]   ;;  %s1371_s2 = inlined_call_operand.hbm [shape: f32[1,128], index: 2, kind: input, shape index: {}]   ;;  %s1372_s3 = inlined_call_operand.hbm [shape: f32[512,128], index: 3, kind: output, shape index: {}]  }
   0x1   :  { %9 = vsyncpa [#allocation6], 0 }
   0x2   :  { %10 = vsyncpa [#allocation4], 0  ;;  %s1149_s12 = smov [#allocation5]   ;;  %s1150_s14 = smov [#allocation2]  }
   0x3   :  { %s28_s13 = sshll.u32 %s1149_s12, 4  ;;  %s16_s15 = sshll.u32 %s1150_s14, 4  ;;  %s29_s13 = int_to_ptr.vmem [resolvable:$true] %s28_s13  ;;  %s1175_s15 = int_to_ptr.vmem [resolvable:$true] %s16_s15 }
   0x4   :  { %s1055_s18 = scalar_lea.hbm %s1370_s1, 640 }
   0x5   :  { %p1056_p0 = scmp.ne.s32.totalorder %s1370_s1, %s1055_s18  ;;  %p1059_p1 = scmp.lt.u32.totalorder %s1055_s18, %s1370_s1 }
   0x7   :  { %p1061_p2 = pnand %p1059_p1, %p1056_p0 }
   0x9   :  { %1064 = shalt.err (!%p1061_p2)
}
   0xa   :  { %s1065_s23 = scalar_lea.vmem %s29_s13, 640  ;;  %p1070_p4 = scmp.lt.s32.totalorder %s29_s13, %s29_s13 }
   0xb   :  { %p1066_p3 = scmp.ne.s32.totalorder %s29_s13, %s1065_s23  ;;  %p1071_p5 = scmp.lt.s32.totalorder %s1065_s23, %s1065_s23 }
   0xd   :  { %p1072_p6 = por %p1071_p5, %p1070_p4 }
   0xf   :  { %p1073_p7 = pnand %p1072_p6, %p1066_p3 }
  0x11   :  { %1076 = shalt.err (!%p1073_p7)
}
  0x12   :  { %s1151_s24 = smov 128   ;;  %s1152_s25 = smov 8  }
  0x13   :  { %34 = dma.hbm_to_vmem [thread:$0]  %s1370_s1, 640, %s29_s13, [#allocation6], %s1151_s24, %s1151_s24, %s1152_s25  }
  0x14   :  { %s1077_s30 = scalar_lea.hbm %s1369_s0, 8192 }
  0x15   :  { %p1078_p8 = scmp.ne.s32.totalorder %s1369_s0, %s1077_s30  ;;  %p1081_p9 = scmp.lt.u32.totalorder %s1077_s30, %s1369_s0 }
  0x17   :  { %p1083_p10 = pnand %p1081_p9, %p1078_p8 }
  0x19   :  { %1086 = shalt.err (!%p1083_p10)
}
  0x1a   :  { %s1087_s8 = scalar_lea.vmem %s1175_s15, 8192  ;;  %p1092_p12 = scmp.lt.s32.totalorder %s1175_s15, %s1175_s15 }
  0x1b   :  { %p1088_p11 = scmp.ne.s32.totalorder %s1175_s15, %s1087_s8  ;;  %p1093_p13 = scmp.lt.s32.totalorder %s1087_s8, %s1087_s8 }
  0x1d   :  { %p1094_p0 = por %p1093_p13, %p1092_p12 }
  0x1f   :  { %p1095_p1 = pnand %p1094_p0, %p1088_p11 }
  0x21   :  { %1098 = shalt.err (!%p1095_p1)
}
  0x22   :  { %22 = dma.hbm_to_vmem [thread:$0]  %s1369_s0, 8192, %s1175_s15, [#allocation3], %s1151_s24, %s1151_s24, %s1152_s25  }
  0x23   :  { %s1153_s10 = smov [#allocation7]   ;;  %s1099_s14 = scalar_lea.hbm %s1371_s2, 16 }
  0x24   :  { %s41_s11 = sshll.u32 %s1153_s10, 4  ;;  %p1100_p2 = scmp.ne.s32.totalorder %s1371_s2, %s1099_s14  ;;  %s42_s11 = int_to_ptr.vmem [resolvable:$true] %s41_s11 }
  0x25   :  { %p1103_p3 = scmp.lt.u32.totalorder %s1099_s14, %s1371_s2 }
  0x27   :  { %p1105_p4 = pnand %p1103_p3, %p1100_p2 }
  0x29   :  { %1108 = shalt.err (!%p1105_p4)
}
  0x2a   :  { %s1109_s20 = scalar_lea.vmem %s42_s11, 16  ;;  %s1113_s0 = scalar_lea.vmem %s42_s11, 32 }
  0x2b   :  { %p1110_p5 = scmp.ne.s32.totalorder %s42_s11, %s1109_s20  ;;  %p1114_p6 = scmp.lt.s32.totalorder %s42_s11, %s42_s11 }
  0x2c   :  { %p1115_p7 = scmp.lt.s32.totalorder %s1113_s0, %s1109_s20 }
  0x2e   :  { %p1116_p8 = por %p1115_p7, %p1114_p6 }
  0x30   :  { %p1117_p9 = pnand %p1116_p8, %p1110_p5 }
  0x32   :  { %1120 = shalt.err (!%p1117_p9)
}
  0x33   :  { %44 = dma.hbm_to_vmem [thread:$0]  %s1371_s2, 16, %s42_s11, [#allocation6]  }
  0x34   :  { %1143 = dma.done.wait [#allocation3], 8192  }
  0x35   :  { %1144 = vsyncadd [#allocation3], 4294959104 }
  0x36   :  { %1145 = dma.done.wait [#allocation6], 656  }
  0x37   :  { %1146 = vsyncadd [#allocation6], 4294966640  ;;  %vm130_vm0 = vcmask 293888   ;;  %v118_v0 = vld [vmem:[#allocation5] sm:$0xff]  ;;  %v119_v1 = vld [vmem:[#allocation5 + $0x8] sm:$0xff]  ;;  %vm323_vm1 = vcmask 1043456  }
  0x38   :  { %v120_v2 = vld [vmem:[#allocation5 + $0x10] sm:$0xff]  ;;  %v1035_v3 = vpack.c.bf16 %v119_v1, %v118_v0  ;;  %v121_v4 = vld [vmem:[#allocation5 + $0x18] sm:$0xff]  ;;  %v54_v5 = vld [vmem:[#allocation2] sm:$0xff]  ;;  %s1154_s2 = smov [#allocation8]  }
  0x39   :  { %v1039_v6 = vpack.c.bf16 %v121_v4, %v120_v2  ;;  %939 = vmatprep.mubr.msk.f32.mxu0 %vm130_vm0, %v54_v5  ;;  %v86_v7 = vld [vmem:[#allocation2 + $0x100] sm:$0xff]  ;;  %v55_v9 = vld [vmem:[#allocation2 + $0x8] sm:$0xff]  ;;  %v56_v11 = vld [vmem:[#allocation2 + $0x10] sm:$0xff]  ;;  %s781_s22 = sshll.u32 %s1154_s2, 4  ;;  %s782_s22 = int_to_ptr.vmem [resolvable:$true] %s781_s22 }
  0x3a   :  { %1036 = vmatprep.subr.bf16.mxu0 %v1035_v3  ;;  %1043 = vmatprep.subr.bf16.mxu1 %v1035_v3  ;;  %v122_v8 = vld [vmem:[#allocation5 + $0x20] sm:$0xf]  ;;  %v87_v10 = vld [vmem:[#allocation2 + $0x108] sm:$0xff]  ;;  %v88_v12 = vld [vmem:[#allocation2 + $0x110] sm:$0xff]  ;;  %s1121_s23 = scalar_lea.vmem %s782_s22, 8192  ;;  %p1126_p11 = scmp.lt.s32.totalorder %s782_s22, %s782_s22 }
  0x3b   :  { %1038 = vmatpush3.bf16.msra.mxu0 %v1035_v3  ;;  %1046 = vmatpush3.bf16.msra.mxu1 %v1035_v3  ;;  %v57_v13 = vld [vmem:[#allocation2 + $0x18] sm:$0xff]  ;;  %v58_v15 = vld [vmem:[#allocation2 + $0x20] sm:$0xff]  ;;  %v59_v17 = vld [vmem:[#allocation2 + $0x28] sm:$0xff]  ;;  %p1122_p10 = scmp.ne.s32.totalorder %s782_s22, %s1121_s23  ;;  %p1127_p12 = scmp.lt.s32.totalorder %s1121_s23, %s1121_s23 }
  0x3c   :  { %1040 = vmatprep.subr.bf16.mxu0 %v1039_v6  ;;  %1044 = vmatprep.subr.bf16.mxu1 %v1039_v6  ;;  %v89_v14 = vld [vmem:[#allocation2 + $0x118] sm:$0xff]  ;;  %v90_v16 = vld [vmem:[#allocation2 + $0x120] sm:$0xff]  ;;  %v91_v18 = vld [vmem:[#allocation2 + $0x128] sm:$0xff] }
  0x3d   :  { %987 = vmatprep.mubr.msk.f32.mxu1 %vm130_vm0, %v86_v7  ;;  %v60_v19 = vld [vmem:[#allocation2 + $0x30] sm:$0xff]  ;;  %v61_v21 = vld [vmem:[#allocation2 + $0x38] sm:$0xff]  ;;  %v62_v23 = vld [vmem:[#allocation2 + $0x40] sm:$0xff]  ;;  %p1128_p13 = por %p1127_p12, %p1126_p11 }
  0x3e   :  { %v92_v20 = vld [vmem:[#allocation2 + $0x130] sm:$0xff]  ;;  %v93_v22 = vld [vmem:[#allocation2 + $0x138] sm:$0xff]  ;;  %v94_v24 = vld [vmem:[#allocation2 + $0x140] sm:$0xff] }
  0x3f   :  { %1042 = vmatpush3.bf16.msra.mxu0 %v1039_v6  ;;  %1047 = vmatpush3.bf16.msra.mxu1 %v1039_v6  ;;  %v63_v25 = vld [vmem:[#allocation2 + $0x48] sm:$0xff]  ;;  %v64_v27 = vld [vmem:[#allocation2 + $0x50] sm:$0xff]  ;;  %v65_v29 = vld [vmem:[#allocation2 + $0x58] sm:$0xff]  ;;  %p1129_p0 = pnand %p1128_p13, %p1122_p10 }
  0x40   :  { %937 = vmatprep.subr.msk.mxu0 %vm323_vm1, %v122_v8  ;;  %1045 = vmatprep.subr.msk.mxu1 %vm323_vm1, %v122_v8  ;;  %v95_v26 = vld [vmem:[#allocation2 + $0x148] sm:$0xff]  ;;  %v96_v28 = vld [vmem:[#allocation2 + $0x150] sm:$0xff]  ;;  %v97_v30 = vld [vmem:[#allocation2 + $0x158] sm:$0xff] }
  0x41   :  { %v66_v31 = vld [vmem:[#allocation2 + $0x60] sm:$0xff]  ;;  %v67_v33 = vld [vmem:[#allocation2 + $0x68] sm:$0xff]  ;;  %v68_v35 = vld [vmem:[#allocation2 + $0x70] sm:$0xff] }
  0x42   :  { %v98_v32 = vld [vmem:[#allocation2 + $0x160] sm:$0xff]  ;;  %v99_v34 = vld [vmem:[#allocation2 + $0x168] sm:$0xff]  ;;  %v100_v36 = vld [vmem:[#allocation2 + $0x170] sm:$0xff] }
  0x43   :  { %938 = vmatpush3.msk.msra.mxu0 %vm323_vm1, %v122_v8  ;;  %1048 = vmatpush3.msk.msra.mxu1 %vm323_vm1, %v122_v8  ;;  %v69_v37 = vld [vmem:[#allocation2 + $0x78] sm:$0xff]  ;;  %v70_v39 = vld [vmem:[#allocation2 + $0x80] sm:$0xff]  ;;  %v71_v41 = vld [vmem:[#allocation2 + $0x88] sm:$0xff] }
  0x44   :  { %940 = vmatmul.mubr.msk.f32.vlgmr.msra.gmra.mrb[0].mxu0 %vm130_vm0, %v55_v9  ;;  %988 = vmatmul.mubr.msk.f32.vlgmr.msra.gmra.mrb[0].mxu1 %vm130_vm0, %v87_v10  ;;  %v101_v38 = vld [vmem:[#allocation2 + $0x178] sm:$0xff]  ;;  %v102_v40 = vld [vmem:[#allocation2 + $0x180] sm:$0xff]  ;;  %v103_v42 = vld [vmem:[#allocation2 + $0x188] sm:$0xff] }
  0x45   :  { %942 = vmatprep.mubr.msk.f32.mxu0 %vm130_vm0, %v56_v11  ;;  %990 = vmatprep.mubr.msk.f32.mxu1 %vm130_vm0, %v88_v12  ;;  %v72_v43 = vld [vmem:[#allocation2 + $0x90] sm:$0xff]  ;;  %v73_v45 = vld [vmem:[#allocation2 + $0x98] sm:$0xff]  ;;  %v74_v47 = vld [vmem:[#allocation2 + $0xa0] sm:$0xff] }
  0x46   :  { %v104_v44 = vld [vmem:[#allocation2 + $0x190] sm:$0xff]  ;;  %v105_v46 = vld [vmem:[#allocation2 + $0x198] sm:$0xff]  ;;  %v106_v48 = vld [vmem:[#allocation2 + $0x1a0] sm:$0xff] }
  0x47   :  { %v75_v49 = vld [vmem:[#allocation2 + $0xa8] sm:$0xff]  ;;  %v76_v51 = vld [vmem:[#allocation2 + $0xb0] sm:$0xff]  ;;  %v77_v53 = vld [vmem:[#allocation2 + $0xb8] sm:$0xff] }
  0x48   :  { %943 = vmatmul.mubr.msk.f32.gmra.mrb[2].mxu0 %vm130_vm0, %v57_v13  ;;  %991 = vmatmul.mubr.msk.f32.gmra.mrb[2].mxu1 %vm130_vm0, %v89_v14  ;;  %v107_v50 = vld [vmem:[#allocation2 + $0x1a8] sm:$0xff]  ;;  %v108_v52 = vld [vmem:[#allocation2 + $0x1b0] sm:$0xff]  ;;  %v109_v54 = vld [vmem:[#allocation2 + $0x1b8] sm:$0xff] }
  0x49   :  { %945 = vmatprep.mubr.msk.f32.mxu0 %vm130_vm0, %v58_v15  ;;  %993 = vmatprep.mubr.msk.f32.mxu1 %vm130_vm0, %v90_v16  ;;  %v78_v55 = vld [vmem:[#allocation2 + $0xc0] sm:$0xff]  ;;  %v79_v57 = vld [vmem:[#allocation2 + $0xc8] sm:$0xff]  ;;  %v80_v59 = vld [vmem:[#allocation2 + $0xd0] sm:$0xff] }
  0x4a   :  { %v110_v56 = vld [vmem:[#allocation2 + $0x1c0] sm:$0xff]  ;;  %v111_v58 = vld [vmem:[#allocation2 + $0x1c8] sm:$0xff]  ;;  %v112_v60 = vld [vmem:[#allocation2 + $0x1d0] sm:$0xff] }
  0x4b   :  { %v81_v61 = vld [vmem:[#allocation2 + $0xd8] sm:$0xff]  ;;  %v82_v63 = vld [vmem:[#allocation2 + $0xe0] sm:$0xff]  ;;  %v83_v1 = vld [vmem:[#allocation2 + $0xe8] sm:$0xff] }
  0x4c   :  { %946 = vmatmul.mubr.msk.f32.gmra.mrb[4].mxu0 %vm130_vm0, %v59_v17  ;;  %994 = vmatmul.mubr.msk.f32.gmra.mrb[4].mxu1 %vm130_vm0, %v91_v18  ;;  %v113_v62 = vld [vmem:[#allocation2 + $0x1d8] sm:$0xff]  ;;  %v114_v0 = vld [vmem:[#allocation2 + $0x1e0] sm:$0xff]  ;;  %v115_v2 = vld [vmem:[#allocation2 + $0x1e8] sm:$0xff] }
  0x4d   :  { %948 = vmatprep.mubr.msk.f32.mxu0 %vm130_vm0, %v60_v19  ;;  %996 = vmatprep.mubr.msk.f32.mxu1 %vm130_vm0, %v92_v20  ;;  %v84_v3 = vld [vmem:[#allocation2 + $0xf0] sm:$0xff]  ;;  %v85_v5 = vld [vmem:[#allocation2 + $0xf8] sm:$0xff]  ;;  %v1288_v7 = vld [vmem:[#allocation7] ss:$0 sm:$0xff] }
  0x4e   :  { %v116_v4 = vld [vmem:[#allocation2 + $0x1f0] sm:$0xff]  ;;  %v117_v6 = vld [vmem:[#allocation2 + $0x1f8] sm:$0xff] }
  0x50   :  { %949 = vmatmul.mubr.msk.f32.gmra.mrb[6].mxu0 %vm130_vm0, %v61_v21  ;;  %997 = vmatmul.mubr.msk.f32.gmra.mrb[6].mxu1 %vm130_vm0, %v93_v22 }
  0x51   :  { %951 = vmatprep.mubr.msk.f32.mxu0 %vm130_vm0, %v62_v23  ;;  %999 = vmatprep.mubr.msk.f32.mxu1 %vm130_vm0, %v94_v24 }
  0x54   :  { %952 = vmatmul.mubr.msk.f32.gmra.mrb[8].mxu0 %vm130_vm0, %v63_v25  ;;  %1000 = vmatmul.mubr.msk.f32.gmra.mrb[8].mxu1 %vm130_vm0, %v95_v26 }
  0x55   :  { %954 = vmatprep.mubr.msk.f32.mxu0 %vm130_vm0, %v64_v27  ;;  %1002 = vmatprep.mubr.msk.f32.mxu1 %vm130_vm0, %v96_v28 }
  0x58   :  { %955 = vmatmul.mubr.msk.f32.gmra.mrb[10].mxu0 %vm130_vm0, %v65_v29  ;;  %1003 = vmatmul.mubr.msk.f32.gmra.mrb[10].mxu1 %vm130_vm0, %v97_v30 }
  0x59   :  { %957 = vmatprep.mubr.msk.f32.mxu0 %vm130_vm0, %v66_v31  ;;  %1005 = vmatprep.mubr.msk.f32.mxu1 %vm130_vm0, %v98_v32 }
  0x5c   :  { %958 = vmatmul.mubr.msk.f32.gmra.mrb[12].mxu0 %vm130_vm0, %v67_v33  ;;  %1006 = vmatmul.mubr.msk.f32.gmra.mrb[12].mxu1 %vm130_vm0, %v99_v34 }
  0x5d   :  { %960 = vmatprep.mubr.msk.f32.mxu0 %vm130_vm0, %v68_v35  ;;  %1008 = vmatprep.mubr.msk.f32.mxu1 %vm130_vm0, %v100_v36 }
  0x60   :  { %961 = vmatmul.mubr.msk.f32.gmra.mrb[14].mxu0 %vm130_vm0, %v69_v37  ;;  %1009 = vmatmul.mubr.msk.f32.gmra.mrb[14].mxu1 %vm130_vm0, %v101_v38 }
  0x61   :  { %963 = vmatprep.mubr.msk.f32.mxu0 %vm130_vm0, %v70_v39  ;;  %1011 = vmatprep.mubr.msk.f32.mxu1 %vm130_vm0, %v102_v40 }
  0x64   :  { %964 = vmatmul.mubr.msk.f32.gmra.mrb[16].mxu0 %vm130_vm0, %v71_v41  ;;  %1012 = vmatmul.mubr.msk.f32.gmra.mrb[16].mxu1 %vm130_vm0, %v103_v42 }
  0x65   :  { %966 = vmatprep.mubr.msk.f32.mxu0 %vm130_vm0, %v72_v43  ;;  %1014 = vmatprep.mubr.msk.f32.mxu1 %vm130_vm0, %v104_v44 }
  0x68   :  { %967 = vmatmul.mubr.msk.f32.gmra.mrb[18].mxu0 %vm130_vm0, %v73_v45  ;;  %1015 = vmatmul.mubr.msk.f32.gmra.mrb[18].mxu1 %vm130_vm0, %v105_v46 }
  0x69   :  { %969 = vmatprep.mubr.msk.f32.mxu0 %vm130_vm0, %v74_v47  ;;  %1017 = vmatprep.mubr.msk.f32.mxu1 %vm130_vm0, %v106_v48 }
  0x6c   :  { %970 = vmatmul.mubr.msk.f32.gmra.mrb[20].mxu0 %vm130_vm0, %v75_v49  ;;  %1018 = vmatmul.mubr.msk.f32.gmra.mrb[20].mxu1 %vm130_vm0, %v107_v50 }
  0x6d   :  { %972 = vmatprep.mubr.msk.f32.mxu0 %vm130_vm0, %v76_v51  ;;  %1020 = vmatprep.mubr.msk.f32.mxu1 %vm130_vm0, %v108_v52 }
  0x70   :  { %973 = vmatmul.mubr.msk.f32.gmra.mrb[22].mxu0 %vm130_vm0, %v77_v53  ;;  %1021 = vmatmul.mubr.msk.f32.gmra.mrb[22].mxu1 %vm130_vm0, %v109_v54 }
  0x71   :  { %975 = vmatprep.mubr.msk.f32.mxu0 %vm130_vm0, %v78_v55  ;;  %1023 = vmatprep.mubr.msk.f32.mxu1 %vm130_vm0, %v110_v56 }
  0x74   :  { %976 = vmatmul.mubr.msk.f32.gmra.mrb[24].mxu0 %vm130_vm0, %v79_v57  ;;  %1024 = vmatmul.mubr.msk.f32.gmra.mrb[24].mxu1 %vm130_vm0, %v111_v58 }
  0x75   :  { %978 = vmatprep.mubr.msk.f32.mxu0 %vm130_vm0, %v80_v59  ;;  %1026 = vmatprep.mubr.msk.f32.mxu1 %vm130_vm0, %v112_v60 }
  0x78   :  { %979 = vmatmul.mubr.msk.f32.gmra.mrb[26].mxu0 %vm130_vm0, %v81_v61  ;;  %1027 = vmatmul.mubr.msk.f32.gmra.mrb[26].mxu1 %vm130_vm0, %v113_v62 }
  0x79   :  { %981 = vmatprep.mubr.msk.f32.mxu0 %vm130_vm0, %v82_v63  ;;  %1029 = vmatprep.mubr.msk.f32.mxu1 %vm130_vm0, %v114_v0 }
  0x7c   :  { %982 = vmatmul.mubr.msk.f32.gmra.mrb[28].mxu0 %vm130_vm0, %v83_v1  ;;  %1030 = vmatmul.mubr.msk.f32.gmra.mrb[28].mxu1 %vm130_vm0, %v115_v2 }
  0x7d   :  { %984 = vmatprep.mubr.msk.f32.mxu0 %vm130_vm0, %v84_v3  ;;  %1032 = vmatprep.mubr.msk.f32.mxu1 %vm130_vm0, %v116_v4 }
  0x80   :  { %985 = vmatmul.mubr.msk.f32.gmra.mrb[30].mxu0 %vm130_vm0, %v85_v5  ;;  %1033 = vmatmul.mubr.msk.f32.gmra.mrb[30].mxu1 %vm130_vm0, %v117_v6 }
 0x117   :  { %v941_v8 = vpop.f32.mrb[0].mxu0  ;;  %v989_v9 = vpop.f32.mrb[0].mxu1 }
 0x118   :  { %v399_v10 = vadd.f32 %v941_v8, %v1288_v7  ;;  %v559_v11 = vadd.f32 %v989_v9, %v1288_v7  ;;  %v393_v12 = vpop.f32.mrb[1].mxu0  ;;  %v553_v13 = vpop.f32.mrb[1].mxu1 }
 0x119   :  { %v394_v14 = vadd.f32 %v1288_v7, %v393_v12  ;;  %v554_v15 = vadd.f32 %v1288_v7, %v553_v13 }
 0x11a   :  { %713 = vst [vmem:[#allocation8 + $0x8] sm:$0xff] %v399_v10  ;;  %745 = vst [vmem:[#allocation8 + $0x108] sm:$0xff] %v559_v11 }
 0x11b   :  { %712 = vst [vmem:[#allocation8] sm:$0xff] %v394_v14  ;;  %744 = vst [vmem:[#allocation8 + $0x100] sm:$0xff] %v554_v15  ;;  %v944_v16 = vpop.f32.mrb[2].mxu0  ;;  %v992_v17 = vpop.f32.mrb[2].mxu1 }
 0x11c   :  { %v409_v18 = vadd.f32 %v944_v16, %v1288_v7  ;;  %v569_v19 = vadd.f32 %v992_v17, %v1288_v7  ;;  %v403_v20 = vpop.f32.mrb[3].mxu0  ;;  %v563_v21 = vpop.f32.mrb[3].mxu1 }
 0x11d   :  { %v404_v22 = vadd.f32 %v1288_v7, %v403_v20  ;;  %v564_v23 = vadd.f32 %v1288_v7, %v563_v21 }
 0x11e   :  { %715 = vst [vmem:[#allocation8 + $0x18] sm:$0xff] %v409_v18  ;;  %747 = vst [vmem:[#allocation8 + $0x118] sm:$0xff] %v569_v19 }
 0x11f   :  { %714 = vst [vmem:[#allocation8 + $0x10] sm:$0xff] %v404_v22  ;;  %746 = vst [vmem:[#allocation8 + $0x110] sm:$0xff] %v564_v23  ;;  %v947_v24 = vpop.f32.mrb[4].mxu0  ;;  %v995_v25 = vpop.f32.mrb[4].mxu1 }
 0x120   :  { %v419_v26 = vadd.f32 %v947_v24, %v1288_v7  ;;  %v579_v27 = vadd.f32 %v995_v25, %v1288_v7  ;;  %v413_v28 = vpop.f32.mrb[5].mxu0  ;;  %v573_v29 = vpop.f32.mrb[5].mxu1 }
 0x121   :  { %v414_v30 = vadd.f32 %v1288_v7, %v413_v28  ;;  %v574_v31 = vadd.f32 %v1288_v7, %v573_v29 }
 0x122   :  { %717 = vst [vmem:[#allocation8 + $0x28] sm:$0xff] %v419_v26  ;;  %749 = vst [vmem:[#allocation8 + $0x128] sm:$0xff] %v579_v27 }
 0x123   :  { %716 = vst [vmem:[#allocation8 + $0x20] sm:$0xff] %v414_v30  ;;  %748 = vst [vmem:[#allocation8 + $0x120] sm:$0xff] %v574_v31  ;;  %v950_v32 = vpop.f32.mrb[6].mxu0  ;;  %v998_v33 = vpop.f32.mrb[6].mxu1 }
 0x124   :  { %v429_v34 = vadd.f32 %v950_v32, %v1288_v7  ;;  %v589_v35 = vadd.f32 %v998_v33, %v1288_v7  ;;  %v423_v36 = vpop.f32.mrb[7].mxu0  ;;  %v583_v37 = vpop.f32.mrb[7].mxu1 }
 0x125   :  { %v424_v38 = vadd.f32 %v1288_v7, %v423_v36  ;;  %v584_v39 = vadd.f32 %v1288_v7, %v583_v37 }
 0x126   :  { %719 = vst [vmem:[#allocation8 + $0x38] sm:$0xff] %v429_v34  ;;  %751 = vst [vmem:[#allocation8 + $0x138] sm:$0xff] %v589_v35 }
 0x127   :  { %718 = vst [vmem:[#allocation8 + $0x30] sm:$0xff] %v424_v38  ;;  %750 = vst [vmem:[#allocation8 + $0x130] sm:$0xff] %v584_v39  ;;  %v953_v40 = vpop.f32.mrb[8].mxu0  ;;  %v1001_v41 = vpop.f32.mrb[8].mxu1 }
 0x128   :  { %v439_v42 = vadd.f32 %v953_v40, %v1288_v7  ;;  %v599_v43 = vadd.f32 %v1001_v41, %v1288_v7  ;;  %v433_v44 = vpop.f32.mrb[9].mxu0  ;;  %v593_v45 = vpop.f32.mrb[9].mxu1 }
 0x129   :  { %v434_v46 = vadd.f32 %v1288_v7, %v433_v44  ;;  %v594_v47 = vadd.f32 %v1288_v7, %v593_v45 }
 0x12a   :  { %721 = vst [vmem:[#allocation8 + $0x48] sm:$0xff] %v439_v42  ;;  %753 = vst [vmem:[#allocation8 + $0x148] sm:$0xff] %v599_v43 }
 0x12b   :  { %720 = vst [vmem:[#allocation8 + $0x40] sm:$0xff] %v434_v46  ;;  %752 = vst [vmem:[#allocation8 + $0x140] sm:$0xff] %v594_v47  ;;  %v956_v48 = vpop.f32.mrb[10].mxu0  ;;  %v1004_v49 = vpop.f32.mrb[10].mxu1 }
 0x12c   :  { %v449_v50 = vadd.f32 %v956_v48, %v1288_v7  ;;  %v609_v51 = vadd.f32 %v1004_v49, %v1288_v7  ;;  %v443_v52 = vpop.f32.mrb[11].mxu0  ;;  %v603_v53 = vpop.f32.mrb[11].mxu1 }
 0x12d   :  { %v444_v54 = vadd.f32 %v1288_v7, %v443_v52  ;;  %v604_v55 = vadd.f32 %v1288_v7, %v603_v53 }
 0x12e   :  { %723 = vst [vmem:[#allocation8 + $0x58] sm:$0xff] %v449_v50  ;;  %755 = vst [vmem:[#allocation8 + $0x158] sm:$0xff] %v609_v51 }
 0x12f   :  { %722 = vst [vmem:[#allocation8 + $0x50] sm:$0xff] %v444_v54  ;;  %754 = vst [vmem:[#allocation8 + $0x150] sm:$0xff] %v604_v55  ;;  %v959_v56 = vpop.f32.mrb[12].mxu0  ;;  %v1007_v57 = vpop.f32.mrb[12].mxu1 }
 0x130   :  { %v459_v58 = vadd.f32 %v959_v56, %v1288_v7  ;;  %v619_v59 = vadd.f32 %v1007_v57, %v1288_v7  ;;  %v453_v60 = vpop.f32.mrb[13].mxu0  ;;  %v613_v61 = vpop.f32.mrb[13].mxu1 }
 0x131   :  { %v454_v62 = vadd.f32 %v1288_v7, %v453_v60  ;;  %v614_v63 = vadd.f32 %v1288_v7, %v613_v61 }
 0x132   :  { %725 = vst [vmem:[#allocation8 + $0x68] sm:$0xff] %v459_v58  ;;  %757 = vst [vmem:[#allocation8 + $0x168] sm:$0xff] %v619_v59 }
 0x133   :  { %724 = vst [vmem:[#allocation8 + $0x60] sm:$0xff] %v454_v62  ;;  %756 = vst [vmem:[#allocation8 + $0x160] sm:$0xff] %v614_v63  ;;  %v962_v0 = vpop.f32.mrb[14].mxu0  ;;  %v1010_v1 = vpop.f32.mrb[14].mxu1 }
 0x134   :  { %v469_v2 = vadd.f32 %v962_v0, %v1288_v7  ;;  %v629_v3 = vadd.f32 %v1010_v1, %v1288_v7  ;;  %v463_v4 = vpop.f32.mrb[15].mxu0  ;;  %v623_v5 = vpop.f32.mrb[15].mxu1 }
 0x135   :  { %v464_v6 = vadd.f32 %v1288_v7, %v463_v4  ;;  %v624_v8 = vadd.f32 %v1288_v7, %v623_v5 }
 0x136   :  { %727 = vst [vmem:[#allocation8 + $0x78] sm:$0xff] %v469_v2  ;;  %759 = vst [vmem:[#allocation8 + $0x178] sm:$0xff] %v629_v3 }
 0x137   :  { %726 = vst [vmem:[#allocation8 + $0x70] sm:$0xff] %v464_v6  ;;  %758 = vst [vmem:[#allocation8 + $0x170] sm:$0xff] %v624_v8  ;;  %v965_v9 = vpop.f32.mrb[16].mxu0  ;;  %v1013_v10 = vpop.f32.mrb[16].mxu1 }
 0x138   :  { %v479_v11 = vadd.f32 %v965_v9, %v1288_v7  ;;  %v639_v12 = vadd.f32 %v1013_v10, %v1288_v7  ;;  %v473_v13 = vpop.f32.mrb[17].mxu0  ;;  %v633_v14 = vpop.f32.mrb[17].mxu1 }
 0x139   :  { %v474_v15 = vadd.f32 %v1288_v7, %v473_v13  ;;  %v634_v16 = vadd.f32 %v1288_v7, %v633_v14 }
 0x13a   :  { %729 = vst [vmem:[#allocation8 + $0x88] sm:$0xff] %v479_v11  ;;  %761 = vst [vmem:[#allocation8 + $0x188] sm:$0xff] %v639_v12 }
 0x13b   :  { %728 = vst [vmem:[#allocation8 + $0x80] sm:$0xff] %v474_v15  ;;  %760 = vst [vmem:[#allocation8 + $0x180] sm:$0xff] %v634_v16  ;;  %v968_v17 = vpop.f32.mrb[18].mxu0  ;;  %v1016_v18 = vpop.f32.mrb[18].mxu1 }
 0x13c   :  { %v489_v19 = vadd.f32 %v968_v17, %v1288_v7  ;;  %v649_v20 = vadd.f32 %v1016_v18, %v1288_v7  ;;  %v483_v21 = vpop.f32.mrb[19].mxu0  ;;  %v643_v22 = vpop.f32.mrb[19].mxu1 }
 0x13d   :  { %v484_v23 = vadd.f32 %v1288_v7, %v483_v21  ;;  %v644_v24 = vadd.f32 %v1288_v7, %v643_v22 }
 0x13e   :  { %731 = vst [vmem:[#allocation8 + $0x98] sm:$0xff] %v489_v19  ;;  %763 = vst [vmem:[#allocation8 + $0x198] sm:$0xff] %v649_v20 }
 0x13f   :  { %730 = vst [vmem:[#allocation8 + $0x90] sm:$0xff] %v484_v23  ;;  %762 = vst [vmem:[#allocation8 + $0x190] sm:$0xff] %v644_v24  ;;  %v971_v25 = vpop.f32.mrb[20].mxu0  ;;  %v1019_v26 = vpop.f32.mrb[20].mxu1 }
 0x140   :  { %v499_v27 = vadd.f32 %v971_v25, %v1288_v7  ;;  %v659_v28 = vadd.f32 %v1019_v26, %v1288_v7  ;;  %v493_v29 = vpop.f32.mrb[21].mxu0  ;;  %v653_v30 = vpop.f32.mrb[21].mxu1 }
 0x141   :  { %v494_v31 = vadd.f32 %v1288_v7, %v493_v29  ;;  %v654_v32 = vadd.f32 %v1288_v7, %v653_v30 }
 0x142   :  { %733 = vst [vmem:[#allocation8 + $0xa8] sm:$0xff] %v499_v27  ;;  %765 = vst [vmem:[#allocation8 + $0x1a8] sm:$0xff] %v659_v28 }
 0x143   :  { %732 = vst [vmem:[#allocation8 + $0xa0] sm:$0xff] %v494_v31  ;;  %764 = vst [vmem:[#allocation8 + $0x1a0] sm:$0xff] %v654_v32  ;;  %v974_v33 = vpop.f32.mrb[22].mxu0  ;;  %v1022_v34 = vpop.f32.mrb[22].mxu1 }
 0x144   :  { %v509_v35 = vadd.f32 %v974_v33, %v1288_v7  ;;  %v669_v36 = vadd.f32 %v1022_v34, %v1288_v7  ;;  %v503_v37 = vpop.f32.mrb[23].mxu0  ;;  %v663_v38 = vpop.f32.mrb[23].mxu1 }
 0x145   :  { %v504_v39 = vadd.f32 %v1288_v7, %v503_v37  ;;  %v664_v40 = vadd.f32 %v1288_v7, %v663_v38 }
 0x146   :  { %735 = vst [vmem:[#allocation8 + $0xb8] sm:$0xff] %v509_v35  ;;  %767 = vst [vmem:[#allocation8 + $0x1b8] sm:$0xff] %v669_v36 }
 0x147   :  { %734 = vst [vmem:[#allocation8 + $0xb0] sm:$0xff] %v504_v39  ;;  %766 = vst [vmem:[#allocation8 + $0x1b0] sm:$0xff] %v664_v40  ;;  %v977_v41 = vpop.f32.mrb[24].mxu0  ;;  %v1025_v42 = vpop.f32.mrb[24].mxu1 }
 0x148   :  { %v519_v43 = vadd.f32 %v977_v41, %v1288_v7  ;;  %v679_v44 = vadd.f32 %v1025_v42, %v1288_v7  ;;  %v513_v45 = vpop.f32.mrb[25].mxu0  ;;  %v673_v46 = vpop.f32.mrb[25].mxu1 }
 0x149   :  { %v514_v47 = vadd.f32 %v1288_v7, %v513_v45  ;;  %v674_v48 = vadd.f32 %v1288_v7, %v673_v46 }
 0x14a   :  { %737 = vst [vmem:[#allocation8 + $0xc8] sm:$0xff] %v519_v43  ;;  %769 = vst [vmem:[#allocation8 + $0x1c8] sm:$0xff] %v679_v44 }
 0x14b   :  { %736 = vst [vmem:[#allocation8 + $0xc0] sm:$0xff] %v514_v47  ;;  %768 = vst [vmem:[#allocation8 + $0x1c0] sm:$0xff] %v674_v48  ;;  %v980_v49 = vpop.f32.mrb[26].mxu0  ;;  %v1028_v50 = vpop.f32.mrb[26].mxu1 }
 0x14c   :  { %v529_v51 = vadd.f32 %v980_v49, %v1288_v7  ;;  %v689_v52 = vadd.f32 %v1028_v50, %v1288_v7  ;;  %v523_v53 = vpop.f32.mrb[27].mxu0  ;;  %v683_v54 = vpop.f32.mrb[27].mxu1 }
 0x14d   :  { %v524_v55 = vadd.f32 %v1288_v7, %v523_v53  ;;  %v684_v56 = vadd.f32 %v1288_v7, %v683_v54 }
 0x14e   :  { %739 = vst [vmem:[#allocation8 + $0xd8] sm:$0xff] %v529_v51  ;;  %771 = vst [vmem:[#allocation8 + $0x1d8] sm:$0xff] %v689_v52 }
 0x14f   :  { %738 = vst [vmem:[#allocation8 + $0xd0] sm:$0xff] %v524_v55  ;;  %770 = vst [vmem:[#allocation8 + $0x1d0] sm:$0xff] %v684_v56  ;;  %v983_v57 = vpop.f32.mrb[28].mxu0  ;;  %v1031_v58 = vpop.f32.mrb[28].mxu1 }
 0x150   :  { %v539_v59 = vadd.f32 %v983_v57, %v1288_v7  ;;  %v699_v60 = vadd.f32 %v1031_v58, %v1288_v7  ;;  %v533_v61 = vpop.f32.mrb[29].mxu0  ;;  %v693_v62 = vpop.f32.mrb[29].mxu1 }
 0x151   :  { %v534_v63 = vadd.f32 %v1288_v7, %v533_v61  ;;  %v694_v0 = vadd.f32 %v1288_v7, %v693_v62 }
 0x152   :  { %741 = vst [vmem:[#allocation8 + $0xe8] sm:$0xff] %v539_v59  ;;  %773 = vst [vmem:[#allocation8 + $0x1e8] sm:$0xff] %v699_v60 }
 0x153   :  { %740 = vst [vmem:[#allocation8 + $0xe0] sm:$0xff] %v534_v63  ;;  %772 = vst [vmem:[#allocation8 + $0x1e0] sm:$0xff] %v694_v0  ;;  %v986_v1 = vpop.f32.mrb[30].mxu0  ;;  %v1034_v2 = vpop.f32.mrb[30].mxu1 }
 0x154   :  { %v549_v3 = vadd.f32 %v986_v1, %v1288_v7  ;;  %v709_v4 = vadd.f32 %v1034_v2, %v1288_v7  ;;  %v543_v5 = vpop.f32.mrb[31].mxu0  ;;  %v703_v6 = vpop.f32.mrb[31].mxu1 }
 0x155   :  { %v544_v8 = vadd.f32 %v1288_v7, %v543_v5  ;;  %v704_v9 = vadd.f32 %v1288_v7, %v703_v6 }
 0x156   :  { %743 = vst [vmem:[#allocation8 + $0xf8] sm:$0xff] %v549_v3  ;;  %775 = vst [vmem:[#allocation8 + $0x1f8] sm:$0xff] %v709_v4 }
 0x157   :  { %742 = vst [vmem:[#allocation8 + $0xf0] sm:$0xff] %v544_v8  ;;  %774 = vst [vmem:[#allocation8 + $0x1f0] sm:$0xff] %v704_v9 }
 0x158   :  { %1132 = shalt.err (!%p1129_p0)
}
 0x159   :  { %s1133_s28 = scalar_lea.hbm %s1372_s3, 8192 }
 0x15a   :  { %p1134_p1 = scmp.ne.s32.totalorder %s1372_s3, %s1133_s28  ;;  %p1137_p2 = scmp.lt.u32.totalorder %s1133_s28, %s1372_s3 }
 0x15c   :  { %p1139_p3 = pnand %p1137_p2, %p1134_p1 }
 0x15e   :  { %1142 = shalt.err (!%p1139_p3)
}
 0x15f   :  { %787 = dma.vmem_to_hbm [thread:$0]  %s782_s22, 8192, %s1372_s3, [#allocation4], %s1151_s24, %s1151_s24, %s1152_s25  }
 0x160   :  { %1147 = dma.done.wait [#allocation4], 8192  }
 0x161   :  { %1148 = vsyncadd [#allocation4], 4294959104 }
 0x162   :  { %791 = vsyncpa [#allocation3], 1 }
 0x163   :  { %792 = vsyncpa [#allocation6], 1 }
 0x164   :  { %793 = vsyncpa [#allocation4], 1 }

</bundles_post_ra>
